<compile_context>
chip_gen: v7x
topology: tpu7x:2x2x1
jax: 0.10.0
libtpu: 0.0.40
codegen_flags: <defaults>
</compile_context>

<pallas_src>
import functools

import jax
import jax.numpy as jnp
from jax.experimental import pallas as pl
from jax.experimental.pallas import tpu as pltpu


NEG_INF = -1e30  # finite masked value: exp(NEG_INF - finite) underflows to exactly 0 in f32


def _vmem_limit(working_set_bytes):
    """Per-generation VMEM budget: ~2x estimated working set, clamped with headroom."""
    try:
        cap = int(getattr(pltpu.get_tpu_info(), "vmem_capacity_bytes", 64 << 20))
    except Exception:  # pragma: no cover - defensive, e.g. interpret mode
        cap = 64 << 20
    headroom = (cap * 4) // 5            # ~51 MiB on v7x, ~102 MiB on v5e/v6e
    return int(min(max(2 * working_set_bytes, 32 << 20), headroom))


# --------------------------------------------------------------------------- #
# Kernel A: fused QKV projection (Q pre-scaled by 1/sqrt(head_dim))
# --------------------------------------------------------------------------- #
def _qkv_proj_kernel(x_ref, wq_ref, wk_ref, wv_ref, q_ref, k_ref, v_ref, *, scale):
    x = x_ref[0]                                                     # (tr, E)
    q = jnp.dot(x, wq_ref[...], preferred_element_type=jnp.float32) * scale
    k = jnp.dot(x, wk_ref[...], preferred_element_type=jnp.float32)
    v = jnp.dot(x, wv_ref[...], preferred_element_type=jnp.float32)
    q_ref[0] = q.astype(q_ref.dtype)
    k_ref[0] = k.astype(k_ref.dtype)
    v_ref[0] = v.astype(v_ref.dtype)


def _qkv_projection(x, wq, wk, wv, *, scale, row_tile):
    B, T, E = x.shape
    D = wq.shape[1]
    tr = row_tile
    nr = T // tr
    cdt = x.dtype
    ci = jnp.dtype(cdt).itemsize
    ws = 2 * tr * E * ci + 3 * 2 * E * D * ci + 3 * 2 * tr * D * ci

    out_sds = jax.ShapeDtypeStruct((B, T, D), cdt)
    row_in = pl.BlockSpec((1, tr, E), lambda b, i: (b, i, 0))
    row_out = pl.BlockSpec((1, tr, D), lambda b, i: (b, i, 0))
    const_w = pl.BlockSpec((E, D), lambda b, i: (0, 0))

    return pl.pallas_call(
        functools.partial(_qkv_proj_kernel, scale=scale),
        out_shape=(out_sds, out_sds, out_sds),
        grid_spec=pltpu.PrefetchScalarGridSpec(
            num_scalar_prefetch=0,
            grid=(B, nr),
            in_specs=[row_in, const_w, const_w, const_w],
            out_specs=[row_out, row_out, row_out],
        ),
        compiler_params=pltpu.CompilerParams(
            dimension_semantics=("parallel", "parallel"),
            vmem_limit_bytes=_vmem_limit(ws),
        ),
    )(x, wq, wk, wv)


# --------------------------------------------------------------------------- #
# Kernel B: flash attention on pre-split (B, H, T, hd) Q/K/V
# --------------------------------------------------------------------------- #
def _flash_kernel(q_ref, k_ref, v_ref, o_ref, m_scr, l_scr, acc_scr, *, q_tile, kv_tile):
    qi = pl.program_id(1)
    ki = pl.program_id(2)

    @pl.when(ki == 0)
    def _init():
        m_scr[...] = jnp.full_like(m_scr, NEG_INF)
        l_scr[...] = jnp.zeros_like(l_scr)
        acc_scr[...] = jnp.zeros_like(acc_scr)

    def scores():
        # All heads in one batched dot_general; no explicit transpose.
        return jnp.einsum('hqd,hkd->hqk', q_ref[0], k_ref[0],
                          preferred_element_type=jnp.float32)        # (H, tq, tk) f32

    def update(s):
        m_prev = m_scr[...]
        m_new = jnp.maximum(m_prev, jnp.max(s, axis=-1, keepdims=True))
        alpha = jnp.exp(m_prev - m_new)                              # f32 stats
        p = jnp.exp(s - m_new)
        l_scr[...] = alpha * l_scr[...] + jnp.sum(p, axis=-1, keepdims=True)
        acc_scr[...] = alpha * acc_scr[...] + jnp.einsum(
            'hqk,hkd->hqd', p.astype(v_ref.dtype), v_ref[0],
            preferred_element_type=jnp.float32)
        m_scr[...] = m_new

    # Strictly-below-diagonal KV tiles: no per-element mask needed (tq == tk, aligned).
    @pl.when(ki < qi)
    def _below_diag():
        update(scores())

    # Diagonal KV tile: apply the causal mask, then finalize this output row tile.
    # (KV tiles with ki > qi do nothing; their K/V index_map is clamped to the
    #  diagonal so no fresh DMA is issued for them.)
    @pl.when(ki == qi)
    def _diag_and_finalize():
        s = scores()
        rows = jax.lax.broadcasted_iota(jnp.int32, (q_tile, kv_tile), 0)
        cols = jax.lax.broadcasted_iota(jnp.int32, (q_tile, kv_tile), 1)
        s = jnp.where((cols <= rows)[None, :, :], s, NEG_INF)
        update(s)
        inv_l = pl.reciprocal(l_scr[...], approx=True)               # EUP slot
        o_ref[0] = (acc_scr[...] * inv_l).astype(o_ref.dtype)


def _flash_attention(q, k, v, *, tq, tk):
    B, H, T, hd = q.shape
    nq, nk = T // tq, T // tk
    cdt = q.dtype
    ci = jnp.dtype(cdt).itemsize
    ws = (3 * 2 * H * max(tq, tk) * hd * ci    # double-buffered q/k/v tiles
          + 2 * H * tq * hd * ci               # output tile
          + H * tq * (hd + 2) * 4)             # f32 scratch (acc, m, l)

    q_spec = pl.BlockSpec((1, H, tq, hd), lambda b, qi, ki: (b, 0, qi, 0))
    # Clamp above-diagonal KV fetches to the diagonal block -> revisited block,
    # no new DMA for causally skipped tiles.
    kv_spec = pl.BlockSpec((1, H, tk, hd),
                           lambda b, qi, ki: (b, 0, jnp.minimum(ki, qi), 0))
    o_spec = pl.BlockSpec((1, H, tq, hd), lambda b, qi, ki: (b, 0, qi, 0))

    return pl.pallas_call(
        functools.partial(_flash_kernel, q_tile=tq, kv_tile=tk),
        out_shape=jax.ShapeDtypeStruct((B, H, T, hd), cdt),
        grid_spec=pltpu.PrefetchScalarGridSpec(
            num_scalar_prefetch=0,
            grid=(B, nq, nk),                  # kv (reduction) axis last
            in_specs=[q_spec, kv_spec, kv_spec],
            out_specs=o_spec,
            scratch_shapes=[
                pltpu.VMEM((H, tq, 1), jnp.float32),   # running max
                pltpu.VMEM((H, tq, 1), jnp.float32),   # running denominator
                pltpu.VMEM((H, tq, hd), jnp.float32),  # output accumulator
            ],
        ),
        compiler_params=pltpu.CompilerParams(
            dimension_semantics=("parallel", "parallel", "arbitrary"),
            vmem_limit_bytes=_vmem_limit(ws),
        ),
    )(q, k, v)


# --------------------------------------------------------------------------- #
# Kernel C: output projection (context @ Wo + bo)
# --------------------------------------------------------------------------- #
def _out_proj_kernel(x_ref, w_ref, b_ref, o_ref):
    y = jnp.dot(x_ref[0], w_ref[...], preferred_element_type=jnp.float32) + b_ref[...]
    o_ref[0] = y.astype(o_ref.dtype)


def _out_projection(ctx, wo, bo, *, row_tile, out_dtype):
    B, T, D = ctx.shape
    tr = row_tile
    nr = T // tr
    ci = jnp.dtype(ctx.dtype).itemsize
    oi = jnp.dtype(out_dtype).itemsize
    ws = 2 * tr * D * ci + 2 * D * D * ci + 2 * D * 4 + 2 * tr * D * oi

    return pl.pallas_call(
        _out_proj_kernel,
        out_shape=jax.ShapeDtypeStruct((B, T, D), out_dtype),
        grid_spec=pltpu.PrefetchScalarGridSpec(
            num_scalar_prefetch=0,
            grid=(B, nr),
            in_specs=[
                pl.BlockSpec((1, tr, D), lambda b, i: (b, i, 0)),
                pl.BlockSpec((D, D), lambda b, i: (0, 0)),
                pl.BlockSpec((1, D), lambda b, i: (0, 0)),
            ],
            out_specs=pl.BlockSpec((1, tr, D), lambda b, i: (b, i, 0)),
        ),
        compiler_params=pltpu.CompilerParams(
            dimension_semantics=("parallel", "parallel"),
            vmem_limit_bytes=_vmem_limit(ws),
        ),
    )(ctx, wo, bo)


# --------------------------------------------------------------------------- #
# Public wrapper matching the PyTorch module's forward (dropout = identity)
# --------------------------------------------------------------------------- #
def multi_head_self_attention(x, wq, wk, wv, wo, bo, num_heads, *,
                              compute_dtype=jnp.bfloat16, q_tile=128):
    """Causal multi-head self-attention (inference; dropout = identity).

    Weights use (in_features, out_features) layout, i.e. y = x @ W (+ b),
    matching a pre-transposed nn.Linear weight. Softmax statistics and the
    attention accumulator are f32 regardless of compute_dtype.
    """
    B, T, E = x.shape
    D = wq.shape[1]
    assert D % num_heads == 0, "d_out must be divisible by num_heads"
    hd = D // num_heads
    out_dtype = x.dtype

    tq = T if T <= q_tile else q_tile
    assert T % tq == 0, "sequence length must be divisible by the query tile"
    tk = tq

    # Cast matmul operands once (halves weight/x DMA for bf16).
    xc = x.astype(compute_dtype)
    wqc, wkc, wvc, woc = (w.astype(compute_dtype) for w in (wq, wk, wv, wo))
    boc = bo.astype(jnp.float32).reshape(1, D)

    # 1) Fused QKV projection (Q pre-scaled by 1/sqrt(hd)).
    q3, k3, v3 = _qkv_projection(xc, wqc, wkc, wvc, scale=hd ** -0.5, row_tile=tq)

    # Head split is pure layout plumbing -> do it once in XLA, feed pre-split
    # (B, H, T, hd) tensors to the flash kernel (no per-head relayout in-kernel).
    def split_heads(t):
        return t.reshape(B, T, num_heads, hd).transpose(0, 2, 1, 3)

    q4, k4, v4 = split_heads(q3), split_heads(k3), split_heads(v3)

    # 2) Flash attention (online softmax, causal).
    ctx4 = _flash_attention(q4, k4, v4, tq=tq, tk=tk)                 # (B, H, T, hd)
    ctx3 = ctx4.transpose(0, 2, 1, 3).reshape(B, T, D)                # (B, T, D)

    # 3) Output projection.
    return _out_projection(ctx3, woc, boc, row_tile=tq, out_dtype=out_dtype)


def ref_forward(x, wq, wk, wv, wo, bo, num_heads):
    """Pure-JAX reference matching the PyTorch module (dropout = identity)."""
    B, T, E = x.shape
    D = wq.shape[1]
    hd = D // num_heads
    q = (x @ wq).reshape(B, T, num_heads, hd).transpose(0, 2, 1, 3)
    k = (x @ wk).reshape(B, T, num_heads, hd).transpose(0, 2, 1, 3)
    v = (x @ wv).reshape(B, T, num_heads, hd).transpose(0, 2, 1, 3)
    s = jnp.einsum('bhqd,bhkd->bhqk', q, k) / (hd ** 0.5)
    mask = jnp.triu(jnp.ones((T, T), bool), k=1)
    s = jnp.where(mask[None, None], -jnp.inf, s)
    w = jax.nn.softmax(s, axis=-1)
    ctx = jnp.einsum('bhqk,bhkd->bhqd', w, v).transpose(0, 2, 1, 3).reshape(B, T, D)
    return ctx @ wo + bo.reshape(1, 1, D)


if __name__ == "__main__":
    # Small config consistent with the module (d_in = d_out = 32, 4 heads).
    B, T, E, D, H = 2, 16, 32, 32, 4

    key = jax.random.PRNGKey(0)
    ks = jax.random.split(key, 6)
    wq = jax.random.normal(ks[0], (E, D), jnp.float32) * 0.05
    wk = jax.random.normal(ks[1], (E, D), jnp.float32) * 0.05
    wv = jax.random.normal(ks[2], (E, D), jnp.float32) * 0.05
    wo = jax.random.normal(ks[3], (D, D), jnp.float32) * 0.05
    bo = jax.random.normal(ks[4], (D,), jnp.float32) * 0.05
    x = jax.random.normal(ks[5], (B, T, E), jnp.float32)

    ref = ref_forward(x, wq, wk, wv, wo, bo, H)

    # Default path: bf16 matmul operands, f32 stats/accumulators, single tile.
    out_bf16 = multi_head_self_attention(x, wq, wk, wv, wo, bo, H)
    out_bf16 = jax.block_until_ready(out_bf16)
    assert out_bf16.shape == (B, T, D)
    diff_bf16 = jnp.max(jnp.abs(out_bf16.astype(jnp.float32) - ref))
    assert jnp.allclose(out_bf16.astype(jnp.float32), ref, atol=2e-2, rtol=2e-2), \
        f"bf16 max abs diff {diff_bf16}"

    # bf16 with q_tile=8 -> 2x2 (q, kv) tiles: exercises online-softmax carry,
    # causal tile skipping (clamped DMA) and the masked-diagonal fast path split.
    out_bf16_t = multi_head_self_attention(x, wq, wk, wv, wo, bo, H, q_tile=8)
    out_bf16_t = jax.block_until_ready(out_bf16_t)
    diff_bf16_t = jnp.max(jnp.abs(out_bf16_t.astype(jnp.float32) - ref))
    assert jnp.allclose(out_bf16_t.astype(jnp.float32), ref, atol=2e-2, rtol=2e-2), \
        f"bf16 tiled max abs diff {diff_bf16_t}"

    # f32 compute path with tiling (tolerance accounts for approx reciprocal).
    out_f32 = multi_head_self_attention(x, wq, wk, wv, wo, bo, H,
                                        compute_dtype=jnp.float32, q_tile=8)
    out_f32 = jax.block_until_ready(out_f32)
    diff_f32 = jnp.max(jnp.abs(out_f32 - ref))
    assert jnp.allclose(out_f32, ref, atol=5e-3, rtol=5e-3), \
        f"f32 max abs diff {diff_f32}"

    print("KERNEL_OK")
</pallas_src>

<mosaic_0001>
module attributes {stable_mosaic.version = 11 : i64} {
  func.func @_qkv_proj_kernel(%arg0: i32, %arg1: i32, %arg2: memref<1x16x32xbf16, #tpu.memory_space<vmem>>, %arg3: memref<32x32xbf16, #tpu.memory_space<vmem>>, %arg4: memref<32x32xbf16, #tpu.memory_space<vmem>>, %arg5: memref<32x32xbf16, #tpu.memory_space<vmem>>, %arg6: memref<1x16x32xbf16, #tpu.memory_space<vmem>>, %arg7: memref<1x16x32xbf16, #tpu.memory_space<vmem>>, %arg8: memref<1x16x32xbf16, #tpu.memory_space<vmem>>) attributes {dimension_semantics = [#tpu.dimension_semantics<parallel>, #tpu.dimension_semantics<parallel>], iteration_bounds = array<i64: 2, 1>, scalar_prefetch = 0 : i64, scratch_operands = 0 : i64, tpu.core_type = #tpu.core_type<tc>, window_params = [{transform_indices = @transform_0, window_bounds = array<i64: 1, 16, 32>}, {pipeline_mode = #tpu.pipeline_mode<synchronous>, transform_indices = @transform_1, window_bounds = array<i64: 32, 32>}, {pipeline_mode = #tpu.pipeline_mode<synchronous>, transform_indices = @transform_2, window_bounds = array<i64: 32, 32>}, {pipeline_mode = #tpu.pipeline_mode<synchronous>, transform_indices = @transform_3, window_bounds = array<i64: 32, 32>}, {transform_indices = @transform_4, window_bounds = array<i64: 1, 16, 32>}, {transform_indices = @transform_5, window_bounds = array<i64: 1, 16, 32>}, {transform_indices = @transform_6, window_bounds = array<i64: 1, 16, 32>}]} {
    %c0 = arith.constant 0 : index
    %c0_0 = arith.constant 0 : index
    %c0_1 = arith.constant 0 : index
    %0 = vector.load %arg2[%c0, %c0_0, %c0_1] : memref<1x16x32xbf16, #tpu.memory_space<vmem>>, vector<1x16x32xbf16>
    %1 = vector.shape_cast %0 : vector<1x16x32xbf16> to vector<16x32xbf16>
    %c0_2 = arith.constant 0 : index
    %c0_3 = arith.constant 0 : index
    %2 = vector.load %arg3[%c0_2, %c0_3] : memref<32x32xbf16, #tpu.memory_space<vmem>>, vector<32x32xbf16>
    %cst = arith.constant dense<0.000000e+00> : vector<16x32xf32>
    %3 = tpu.matmul %1, %2, %cst {dimension_numbers = #tpu.dot_dimension_numbers<[1], [0], [0], [1], [0, 0, 1, 1], [], []>} : vector<16x32xbf16>, vector<32x32xbf16>, vector<16x32xf32> -> vector<16x32xf32>
    %cst_4 = arith.constant 0.353553385 : f32
    %4 = vector.broadcast %cst_4 : f32 to vector<16x32xf32>
    %5 = arith.mulf %3, %4 : vector<16x32xf32>
    %c0_5 = arith.constant 0 : index
    %c0_6 = arith.constant 0 : index
    %6 = vector.load %arg4[%c0_5, %c0_6] : memref<32x32xbf16, #tpu.memory_space<vmem>>, vector<32x32xbf16>
    %cst_7 = arith.constant dense<0.000000e+00> : vector<16x32xf32>
    %7 = tpu.matmul %1, %6, %cst_7 {dimension_numbers = #tpu.dot_dimension_numbers<[1], [0], [0], [1], [0, 0, 1, 1], [], []>} : vector<16x32xbf16>, vector<32x32xbf16>, vector<16x32xf32> -> vector<16x32xf32>
    %c0_8 = arith.constant 0 : index
    %c0_9 = arith.constant 0 : index
    %8 = vector.load %arg5[%c0_8, %c0_9] : memref<32x32xbf16, #tpu.memory_space<vmem>>, vector<32x32xbf16>
    %cst_10 = arith.constant dense<0.000000e+00> : vector<16x32xf32>
    %9 = tpu.matmul %1, %8, %cst_10 {dimension_numbers = #tpu.dot_dimension_numbers<[1], [0], [0], [1], [0, 0, 1, 1], [], []>} : vector<16x32xbf16>, vector<32x32xbf16>, vector<16x32xf32> -> vector<16x32xf32>
    %10 = arith.truncf %5 : vector<16x32xf32> to vector<16x32xbf16>
    %c0_11 = arith.constant 0 : index
    %c0_12 = arith.constant 0 : index
    %c0_13 = arith.constant 0 : index
    %11 = vector.load %arg6[%c0_11, %c0_12, %c0_13] : memref<1x16x32xbf16, #tpu.memory_space<vmem>>, vector<1x16x32xbf16>
    %12 = vector.shape_cast %11 : vector<1x16x32xbf16> to vector<16x32xbf16>
    %13 = vector.shape_cast %10 : vector<16x32xbf16> to vector<1x16x32xbf16>
    tpu.vector_store %arg6[%c0_11, %c0_12, %c0_13], %13 {strides = array<i32>} : memref<1x16x32xbf16, #tpu.memory_space<vmem>>, vector<1x16x32xbf16>,
    %14 = arith.truncf %7 : vector<16x32xf32> to vector<16x32xbf16>
    %c0_14 = arith.constant 0 : index
    %c0_15 = arith.constant 0 : index
    %c0_16 = arith.constant 0 : index
    %15 = vector.load %arg7[%c0_14, %c0_15, %c0_16] : memref<1x16x32xbf16, #tpu.memory_space<vmem>>, vector<1x16x32xbf16>
    %16 = vector.shape_cast %15 : vector<1x16x32xbf16> to vector<16x32xbf16>
    %17 = vector.shape_cast %14 : vector<16x32xbf16> to vector<1x16x32xbf16>
    tpu.vector_store %arg7[%c0_14, %c0_15, %c0_16], %17 {strides = array<i32>} : memref<1x16x32xbf16, #tpu.memory_space<vmem>>, vector<1x16x32xbf16>,
    %18 = arith.truncf %9 : vector<16x32xf32> to vector<16x32xbf16>
    %c0_17 = arith.constant 0 : index
    %c0_18 = arith.constant 0 : index
    %c0_19 = arith.constant 0 : index
    %19 = vector.load %arg8[%c0_17, %c0_18, %c0_19] : memref<1x16x32xbf16, #tpu.memory_space<vmem>>, vector<1x16x32xbf16>
    %20 = vector.shape_cast %19 : vector<1x16x32xbf16> to vector<16x32xbf16>
    %21 = vector.shape_cast %18 : vector<16x32xbf16> to vector<1x16x32xbf16>
    tpu.vector_store %arg8[%c0_17, %c0_18, %c0_19], %21 {strides = array<i32>} : memref<1x16x32xbf16, #tpu.memory_space<vmem>>, vector<1x16x32xbf16>,
    return
  }
  func.func @transform_0(%arg0: i32, %arg1: i32) -> (i32, i32, i32) {
    %c0_i32 = arith.constant 0 : i32
    %c0_i32_0 = arith.constant 0 : i32
    return %arg0, %arg1, %c0_i32 : i32, i32, i32
  }
  func.func @transform_1(%arg0: i32, %arg1: i32) -> (i32, i32) {
    %c0_i32 = arith.constant 0 : i32
    %c0_i32_0 = arith.constant 0 : i32
    %c0_i32_1 = arith.constant 0 : i32
    return %c0_i32, %c0_i32_0 : i32, i32
  }
  func.func @transform_2(%arg0: i32, %arg1: i32) -> (i32, i32) {
    %c0_i32 = arith.constant 0 : i32
    %c0_i32_0 = arith.constant 0 : i32
    %c0_i32_1 = arith.constant 0 : i32
    return %c0_i32, %c0_i32_0 : i32, i32
  }
  func.func @transform_3(%arg0: i32, %arg1: i32) -> (i32, i32) {
    %c0_i32 = arith.constant 0 : i32
    %c0_i32_0 = arith.constant 0 : i32
    %c0_i32_1 = arith.constant 0 : i32
    return %c0_i32, %c0_i32_0 : i32, i32
  }
  func.func @transform_4(%arg0: i32, %arg1: i32) -> (i32, i32, i32) {
    %c0_i32 = arith.constant 0 : i32
    %c0_i32_0 = arith.constant 0 : i32
    return %arg0, %arg1, %c0_i32 : i32, i32, i32
  }
  func.func @transform_5(%arg0: i32, %arg1: i32) -> (i32, i32, i32) {
    %c0_i32 = arith.constant 0 : i32
    %c0_i32_0 = arith.constant 0 : i32
    return %arg0, %arg1, %c0_i32 : i32, i32, i32
  }
  func.func @transform_6(%arg0: i32, %arg1: i32) -> (i32, i32, i32) {
    %c0_i32 = arith.constant 0 : i32
    %c0_i32_0 = arith.constant 0 : i32
    return %arg0, %arg1, %c0_i32 : i32, i32, i32
  }
}

</mosaic_0001>

<bundles_post_ra>
// kernel: tpu_custom_call.1
= control target key start
LH: loop header
LB: loop body
LE: loop exit
PB: predicated region body
PF: predicated region fallthrough
CT: control target
= control target key end

     0   :  { %12 = vsyncpa [#allocation3], 0  ;;  %s1726_s0 = inlined_call_operand.hbm [shape: bf16[2,16,32], index: 0, kind: input, shape index: {}]   ;;  %s1727_s1 = inlined_call_operand.hbm [shape: bf16[32,32], index: 1, kind: input, shape index: {}]   ;;  %s1728_s2 = inlined_call_operand.hbm [shape: bf16[32,32], index: 2, kind: input, shape index: {}]   ;;  %s1729_s3 = inlined_call_operand.hbm [shape: bf16[32,32], index: 3, kind: input, shape index: {}]   ;;  %s1730_s4 = inlined_call_operand.hbm [shape: bf16[2,16,32], index: 4, kind: output, shape index: {0}]   ;;  %s1731_s5 = inlined_call_operand.hbm [shape: bf16[2,16,32], index: 5, kind: output, shape index: {1}]   ;;  %s1732_s6 = inlined_call_operand.hbm [shape: bf16[2,16,32], index: 6, kind: output, shape index: {2}]  }
   0x1   :  { %14 = vsyncpa [#allocation3 + $0x1], 0 }
   0x2   :  { %15 = vsyncpa [#allocation6], 0 }
   0x3   :  { %16 = vsyncpa [#allocation9], 0 }
   0x4   :  { %17 = vsyncpa [#allocation4], 0 }
   0x5   :  { %19 = vsyncpa [#allocation4 + $0x1], 0 }
   0x6   :  { %20 = vsyncpa [#allocation12], 0 }
   0x7   :  { %22 = vsyncpa [#allocation12 + $0x1], 0  ;;  %s1337_s21 = smov 0   ;;  %s1339_s22 = smov 0  }
   0x8   :  { %s1341_s23 = smov 0   ;;  %s1343_s24 = smov 0  }
   0x9   :  { %s1345_s25 = smov 0   ;;  %s1347_s26 = smov 0  }
   0xa LB: > { %1739 = sst [smem:[#allocation19_spill]] %s1267_s21  ;;  %s1368_s27 = sadd.s32 4294967295, %s1287_s26   ;;  %s1287_s26 = sphi %s1347_s26, %s28_s26   ;;  %s1283_s25 = sphi %s1345_s25, %s1765_s25   ;;  %s1279_s24 = sphi %s1343_s24, %s1764_s24   ;;  %s1275_s23 = sphi %s1341_s23, %s1763_s23   ;;  %s1271_s22 = sphi %s1339_s22, %s1762_s22   ;;  %s1267_s21 = sphi %s1337_s21, %s1761_s21  }
   0xb   : > { %s1734_s28 = sadd.s32 4294967294, %s1287_s26   ;;  %p62_p0 = scmp.ne.s32.totalorder %s1271_s22, %s1267_s21 }
   0xc   : > { %p1733_p1 = scmp.eq.s32.totalorder %s1368_s27, 0  ;;  %p157_p3 = scmp.eq.s32.totalorder %s1734_s28, 1 }
   0xd   : > { %p821_p5 = scmp.ge.s32.totalorder %s1287_s26, 1  ;;  %p220_p7 = scmp.lt.s32.totalorder %s1287_s26, 3 }
   0xe   : > { %p1379_p4 = por %p1733_p1, %p62_p0  ;;  %p1384_p6 = por %p157_p3, %p62_p0 }
   0xf   : > { %p1389_p8 = pnand %p821_p5, %p220_p7  ;;  %s1289_s8 = smov [#allocation5]  }
  0x10   : > { %s1740_s29 = scalar_select %p1379_p4, 1, 0 }
  0x11   : > { %s1741_s30 = scalar_select %p1384_p6, 1, 0 }
  0x12   : > { %s1743_s7 = scalar_select %p1389_p8, 1, 0 }
  0x13   : > { %1742 = sst [smem:[#allocation20_spill]] %s1741_s30  ;;  %s232_s9 = sshll.u32 %s1289_s8, 4  ;;  %s1393_s9 = int_to_ptr.vmem [resolvable:$true] %s232_s9 }
  0x14   : > { %p927_p9 = pneg %p1389_p8  ;;  %s1290_s11 = smov [#allocation7]  }
  0x15   : > { %s245_s12 = sshll.u32 %s1290_s11, 4  ;;  %s1291_s13 = smov [#allocation8]   ;;  %s1404_s12 = int_to_ptr.vmem [resolvable:$true] %s245_s12 }
  0x16   : > { %p1400_p11 = pnand %p927_p9, %p1733_p1  ;;  %s1406_s14 = sshll.u32 %s1291_s13, 4  ;;  %s259_s14 = int_to_ptr.vmem [resolvable:$true] %s1406_s14 }
  0x17   : > { %s1023_s17 = scalar_lea.hbm %s1727_s1, 256 }
  0x18   : > { %p1024_p12 = scmp.ne.s32.totalorder %s1727_s1, %s1023_s17  ;;  %p1416_p13 = pneg %p1400_p11 }
  0x19   : > { %p1030_p5 = scmp.lt.u32.totalorder %s1023_s17, %s1727_s1 }
  0x1a   : > { %p1026_p0 = pnand %p1416_p13, %p1024_p12 }
  0x1c   : > { %p1027_p3 = pneg %p1026_p0 }
  0x1e   : > { %p1032_p7 = pnand %p1030_p5, %p1027_p3 }
  0x20   : > { %1035 = shalt.err (!%p1032_p7)
}
  0x21   : > { %s1036_s13 = scalar_lea.vmem %s1393_s9, 256  ;;  %p1044_p2 = scmp.lt.s32.totalorder %s1393_s9, %s1393_s9 }
  0x22   : > { %p1037_p9 = scmp.ne.s32.totalorder %s1393_s9, %s1036_s13  ;;  %p1045_p6 = scmp.lt.s32.totalorder %s1036_s13, %s1036_s13 }
  0x24   : > { %p1039_p10 = pnand %p1037_p9, %p1416_p13  ;;  %p1046_p12 = por %p1045_p6, %p1044_p2 }
  0x26   : > { %p1040_p1 = pneg %p1039_p10 }
  0x28   : > { %p1047_p0 = pnand %p1046_p12, %p1040_p1 }
  0x2a   : > { %1050 = shalt.err (!%p1047_p0)
}
  0x2b   : > { %s1292_s15 = smov 64   ;;  %s1293_s16 = smov 4  }
  0x2c   : > { %930 = dma.hbm_to_vmem [thread:$0]  (!%p1400_p11), %s1727_s1, 256, %s1393_s9, [#allocation6], %s1292_s15, %s1292_s15, %s1293_s16  }
  0x2d   : > { %s1051_s11 = scalar_lea.hbm %s1728_s2, 256 }
  0x2e   : > { %p1052_p1 = scmp.ne.s32.totalorder %s1728_s2, %s1051_s11  ;;  %p1058_p10 = scmp.lt.u32.totalorder %s1051_s11, %s1728_s2 }
  0x30   : > { %p1054_p2 = pnand %p1052_p1, %p1416_p13 }
  0x32   : > { %p1055_p6 = pneg %p1054_p2 }
  0x34   : > { %p1060_p3 = pnand %p1058_p10, %p1055_p6 }
  0x36   : > { %1063 = shalt.err (!%p1060_p3)
}
  0x37   : > { %s1064_s9 = scalar_lea.vmem %s1404_s12, 256  ;;  %p1072_p12 = scmp.lt.s32.totalorder %s1404_s12, %s1404_s12 }
  0x38   : > { %p1065_p5 = scmp.ne.s32.totalorder %s1404_s12, %s1064_s9  ;;  %p1073_p0 = scmp.lt.s32.totalorder %s1064_s9, %s1064_s9 }
  0x3a   : > { %p1067_p7 = pnand %p1065_p5, %p1416_p13  ;;  %p1074_p1 = por %p1073_p0, %p1072_p12 }
  0x3c   : > { %p1068_p9 = pneg %p1067_p7 }
  0x3e   : > { %p1075_p2 = pnand %p1074_p1, %p1068_p9 }
  0x40   : > { %1078 = shalt.err (!%p1075_p2)
}
  0x41   : > { %933 = dma.hbm_to_vmem [thread:$0]  (!%p1400_p11), %s1728_s2, 256, %s1404_s12, [#allocation6], %s1292_s15, %s1292_s15, %s1293_s16  }
  0x42   : > { %s1079_s18 = scalar_lea.hbm %s1729_s3, 256 }
  0x43   : > { %p1080_p6 = scmp.ne.s32.totalorder %s1729_s3, %s1079_s18  ;;  %p1086_p5 = scmp.lt.u32.totalorder %s1079_s18, %s1729_s3 }
  0x45   : > { %p1082_p10 = pnand %p1080_p6, %p1416_p13 }
  0x47   : > { %p1083_p3 = pneg %p1082_p10 }
  0x49   : > { %p1088_p7 = pnand %p1086_p5, %p1083_p3 }
  0x4b   : > { %1091 = shalt.err (!%p1088_p7)
}
  0x4c   : > { %s1092_s9 = scalar_lea.vmem %s259_s14, 256  ;;  %p1100_p1 = scmp.lt.s32.totalorder %s259_s14, %s259_s14 }
  0x4d   : > { %p1093_p9 = scmp.ne.s32.totalorder %s259_s14, %s1092_s9  ;;  %p1101_p2 = scmp.lt.s32.totalorder %s1092_s9, %s1092_s9 }
  0x4f   : > { %p1095_p12 = pnand %p1093_p9, %p1416_p13  ;;  %p1102_p4 = por %p1101_p2, %p1100_p1 }
  0x51   : > { %p1096_p0 = pneg %p1095_p12 }
  0x53   : > { %p1103_p8 = pnand %p1102_p4, %p1096_p0 }
  0x55   : > { %1106 = shalt.err (!%p1103_p8)
}
  0x56   : > { %936 = dma.hbm_to_vmem [thread:$0]  (!%p1400_p11), %s1729_s3, 256, %s259_s14, [#allocation9], %s1292_s15, %s1292_s15, %s1293_s16  }
  0x57   : > { %s49_s20 = sadd.s32 1, %s1275_s23  ;;  %s40_s10 = sadd.s32 1, %s1283_s25 }
  0x58   : > { %p56_p4 = scmp.ne.s32.totalorder %s1275_s23, %s1271_s22  ;;  %p42_p8 = scmp.ge.s32.totalorder %s40_s10, 2 }
  0x59   : > { %p57_p13 = scmp.eq.s32.totalorder %s1287_s26, 0  ;;  %p1746_p6 = scmp.eq.s32.totalorder %s1368_s27, 1 }
  0x5a   : > { %p954_p3 = scmp.lt.s32.totalorder %s1287_s26, 2  ;;  %s1767_s10 = smov (%p42_p8, %s40_s10), 0 }
  0x5b   : > { %p1495_p10 = por %p1746_p6, %p56_p4  ;;  %p58_p5 = por %p57_p13, %p56_p4 }
  0x5c   : > { %s272_s30 = sand.u32 1, %s1275_s23   ;;  %s44_s17 = ssub.s32 %s1283_s25, %s1767_s10 }
  0x5d   : > { %p47_p7 = scmp.eq.s32.totalorder %s44_s17, 0  ;;  %s826_s14 = sshll.u32 %s272_s30, 3 }
  0x5e   : > { %s864_s18 = sshll.u32 %s1283_s25, 7  ;;  %s276_s9 = scalar_lea.vmem [#allocation2], %s826_s14 }
  0x5f   : > { %s1507_s19 = scalar_select %p47_p7, %s1275_s23, %s49_s20  }
  0x60   : > { %s1512_s13 = scalar_lea.hbm %s1726_s0, %s864_s18  ;;  %s285_s12 = sshll.u32 %s276_s9, 4  ;;  %s1514_s12 = int_to_ptr.vmem [resolvable:$true] %s285_s12 }
  0x61   : > { %p1518_p11 = pnand %p954_p3, %p58_p5  ;;  %s1522_s20 = scalar_lea.sflag [#allocation3], %s272_s30 }
  0x62   : > { %s1107_s17 = scalar_lea.hbm %s1512_s13, 128  ;;  %s1112_s8 = scalar_lea.hbm %s1726_s0, 256 }
  0x63   : > { %p1108_p9 = scmp.ne.s32.totalorder %s1512_s13, %s1107_s17  ;;  %p1109_p12 = pneg %p1518_p11 }
  0x64   : > { %p1113_p2 = scmp.lt.u32.totalorder %s1512_s13, %s1726_s0  ;;  %p1114_p4 = scmp.lt.u32.totalorder %s1112_s8, %s1107_s17 }
  0x65   : > { %p1110_p0 = pnand %p1109_p12, %p1108_p9  ;;  %p1116_p13 = scmp.lt.u32.totalorder %s1107_s17, %s1512_s13 }
  0x66   : > { %p1115_p8 = por %p1114_p4, %p1113_p2 }
  0x67   : > { %p1111_p1 = pneg %p1110_p0 }
  0x68   : > { %p1117_p6 = por %p1116_p13, %p1115_p8 }
  0x6a   : > { %p1118_p3 = pnand %p1117_p6, %p1111_p1 }
  0x6c   : > { %1121 = shalt.err (!%p1118_p3)
}
  0x6d   : > { %s1122_s30 = scalar_lea.vmem %s1514_s12, 128  ;;  %s1294_s14 = smov [#allocation2]  }
  0x6e   : > { %p1123_p5 = scmp.ne.s32.totalorder %s1514_s12, %s1122_s30  ;;  %s1127_s18 = sshll.u32 %s1294_s14, 4  ;;  %s1128_s18 = int_to_ptr.vmem [resolvable:$false] %s1127_s18 }
  0x6f   : > { %s1129_s11 = scalar_lea.vmem %s1128_s18, 256  ;;  %p1130_p0 = scmp.lt.s32.totalorder %s1514_s12, %s1128_s18 }
  0x70   : > { %p1125_p7 = pnand %p1123_p5, %p1109_p12  ;;  %p1131_p2 = scmp.lt.s32.totalorder %s1129_s11, %s1122_s30 }
  0x72   : > { %p1126_p9 = pneg %p1125_p7  ;;  %p1132_p4 = por %p1131_p2, %p1130_p0 }
  0x74   : > { %p1133_p8 = pnand %p1132_p4, %p1126_p9 }
  0x76   : > { %1136 = shalt.err (!%p1133_p8)
}
  0x77   : > { %940 = dma.hbm_to_vmem [thread:$0]  (!%p1518_p11), %s1512_s13, 128, %s1514_s12, %s1522_s20, %s1292_s15, %s1292_s15, %s1293_s16  }
  0x78   : > { %p1749_p12 = scmp.ne.s32.totalorder %s1743_s7, 0 }
  0x79   : > { %s1556_s17 = sand.u32 (!%p1749_p12), 1, %s1271_s22   ;;  %p1750_p1 = scmp.ne.s32.totalorder (!%p1749_p12), %s1740_s29, 0 }
  0x7a   : > { %297 = sbr.rel (%p1749_p12) target bundleno = 426 (0x1aa), region = 36  ;;  %s1559_s8 = sshll.u32 (!%p1749_p12), %s1556_s17, 3 }
  0x7b   : > { %s300_s21 = scalar_lea.sflag (!%p1749_p12), [#allocation3], %s1556_s17  ;;  %s303_s9 = scalar_lea.vmem (!%p1749_p12), [#allocation2], %s1559_s8 }
  0x81   : > { %1246 = dma.done.wait (%p1750_p1), %s300_s21, 128  }
  0x82   : > { %1248 = vsyncadd (%p1750_p1), %s300_s21, 4294967168  ;;  %p1751_p11 = scmp.eq.s32.totalorder %s1368_s27, 0 }
  0x84   : > { %1250 = dma.done.wait (%p1751_p11), [#allocation6], 512   ;;  %p1752_p13 = pmov %p1751_p11 }
  0x85   : > { %p1753_p6 = pmov %p1751_p11 }
  0x86   : > { %1252 = vsyncadd (%p1752_p13), [#allocation6], 4294966784 }
  0x87   : > { %1254 = dma.done.wait (%p1753_p6), [#allocation9], 256   ;;  %p1754_p3 = pmov %p1753_p6 }
  0x88   : > { %v1295_v0 = vmov 0.0   ;;  %vm1296_vm0 = vmmov 0   ;;  %v1016_v1 = vld [vmem:[#allocation5] sm:$0xff]   ;;  %v1017_v2 = vld [vmem:[#allocation5 + $0x8] sm:$0xff]   ;;  %v1018_v3 = vld [vmem:[#allocation7] sm:$0xff]   ;;  %vm382_vm1 = vcmask 261120  }
  0x89   : > { %1256 = vsyncadd (%p1754_p3), [#allocation9], 4294967040  ;;  %883 = vmatprep.subr.bf16.mxu0 %v1295_v0  ;;  %891 = vmatprep.subr.bf16.mxu1 %v1295_v0  ;;  %v1019_v4 = vld [vmem:[%s303_s9] sm:$0xff]   ;;  %v1020_v6 = vld [vmem:[#allocation8] sm:$0xff]   ;;  %s346_s29 = scalar_lea.vmem [#allocation11], %s1559_s8  ;;  %s579_s15 = sand.u32 1, %s1368_s27  }
  0x8a   : > { %887 = vmatprep.mubr.msk.bf16.mxu0 %vm1296_vm0, %v1295_v0  ;;  %895 = vmatprep.mubr.msk.bf16.mxu1 %vm1296_vm0, %v1295_v0  ;;  %v1021_v5 = vld [vmem:[#allocation7 + $0x8] sm:$0xff]   ;;  %v1022_v7 = vld [vmem:[#allocation8 + $0x8] sm:$0xff]   ;;  %s618_s7 = sshll.u32 %s346_s29, 4  ;;  %s339_s16 = scalar_lea.vmem [#allocation10], %s1559_s8  ;;  %vm551_vm2 = vcmask 257024   ;;  %s1584_s7 = int_to_ptr.vmem [resolvable:$true] %s618_s7 }
  0x8b   : > { %884 = vmatpush3.bf16.msra.mxu0 %v1016_v1  ;;  %892 = vmatpush3.bf16.msra.mxu1 %v1018_v3  ;;  %s600_s13 = sshll.u32 %s339_s16, 4  ;;  %s1582_s12 = sshll.u32 %s1279_s24, 7  ;;  %s1600_s13 = int_to_ptr.vmem [resolvable:$true] %s600_s13 }
  0x8c   : > { %885 = vmatprep.subr.bf16.mxu0 %v1295_v0  ;;  %893 = vmatprep.subr.bf16.mxu1 %v1295_v0  ;;  %s1592_s20 = scalar_lea.hbm %s1731_s5, %s1582_s12  ;;  %s1598_s18 = scalar_lea.hbm %s1730_s4, %s1582_s12 }
  0x8d   : > { %s1605_s11 = scalar_lea.vmem [#allocation13], %s1559_s8  ;;  %s1608_s9 = scalar_lea.sflag [#allocation12], %s579_s15 }
  0x8e   : > { %s1137_s24 = scalar_lea.vmem %s1584_s7, 128  ;;  %s1297_s27 = smov [#allocation11]  }
  0x8f   : > { %886 = vmatpush3.bf16.msra.mxu0 %v1017_v2  ;;  %894 = vmatpush3.bf16.msra.mxu1 %v1021_v5  ;;  %p1138_p5 = scmp.ne.s32.totalorder %s1584_s7, %s1137_s24  ;;  %s1141_s30 = sshll.u32 %s1297_s27, 4  ;;  %s1142_s30 = int_to_ptr.vmem [resolvable:$false] %s1141_s30 }
  0x90   : > { %899 = vmatprep.subr.bf16.mxu0 %v1295_v0  ;;  %s1143_s14 = scalar_lea.vmem %s1142_s30, 256  ;;  %p1144_p0 = scmp.lt.s32.totalorder %s1584_s7, %s1142_s30 }
  0x91   : > { %p1139_p7 = pnand %p1138_p5, %p1495_p10  ;;  %p1145_p2 = scmp.lt.s32.totalorder %s1143_s14, %s1137_s24 }
  0x92   : > { %888 = vmatmul.mubr.msk.bf16.vlgmr.msra.gmra.mrb[0].mxu0 %vm382_vm1, %v1019_v4  ;;  %896 = vmatmul.mubr.msk.bf16.vlgmr.msra.gmra.mrb[0].mxu1 %vm382_vm1, %v1019_v4 }
  0x93   : > { %900 = vmatpush3.bf16.msra.mxu0 %v1020_v6  ;;  %903 = vmatprep.mubr.msk.bf16.mxu0 %vm1296_vm0, %v1295_v0  ;;  %p1140_p9 = pneg %p1139_p7  ;;  %p1146_p4 = por %p1145_p2, %p1144_p0 }
  0x94   : > { %901 = vmatprep.subr.bf16.mxu0 %v1295_v0 }
  0x95   : > { %p1147_p8 = pnand %p1146_p4, %p1140_p9 }
  0x97   : > { %902 = vmatpush3.bf16.msra.mxu0 %v1022_v7 }
  0x9a   : > { %904 = vmatmul.mubr.msk.bf16.vlgmr.msra.gmra.mrb[4].mxu0 %vm382_vm1, %v1019_v4 }
 0x165   : > { %v420_v8 = vpop.f32.mrb[0].mxu0  ;;  %v479_v12 = vpop.f32.mrb[0].mxu1 }
 0x166   : > { %v427_v9 = vmul.f32 0.35355338, %v420_v8  ;;  %v889_v10 = vpop.f32.mrb[1].mxu0  ;;  %v867_v16 = vpack.c.bf16 %v479_v12, %v479_v12  ;;  %v897_v17 = vpop.f32.mrb[1].mxu1 }
 0x167   : > { %v423_v11 = vpop.f32.mrb[2].mxu0  ;;  %v482_v18 = vpop.f32.mrb[2].mxu1 }
 0x168   : > { %v865_v13 = vpack.c.bf16 %v427_v9, %v427_v9  ;;  %v428_v14 = vmul.f32 0.35355338, %v423_v11  ;;  %v890_v15 = vpop.f32.mrb[3].mxu0  ;;  %562 = vst.msk [vmem:[%s346_s29] sm:$0xf] %vm551_vm2, %v867_v16  ;;  %v868_v20 = vpack.c.bf16 %v482_v18, %v482_v18  ;;  %v898_v21 = vpop.f32.mrb[3].mxu1 }
 0x16a   : > { %552 = vst.msk [vmem:[%s339_s16] sm:$0xf] %vm551_vm2, %v865_v13  ;;  %v866_v19 = vpack.c.bf16 %v428_v14, %v428_v14  ;;  %563 = vst.msk [vmem:[%s346_s29 + $0x4] sm:$0xf] %vm551_vm2, %v868_v20 }
 0x16c   : > { %553 = vst.msk [vmem:[%s339_s16 + $0x4] sm:$0xf] %vm551_vm2, %v866_v19 }
 0x16d   : > { %v536_v22 = vpop.f32.mrb[4].mxu0 }
 0x16e   : > { %1150 = shalt.err (!%p1147_p8)
}
 0x16f   : > { %s1151_s8 = scalar_lea.hbm %s1592_s20, 128  ;;  %s1155_s16 = scalar_lea.hbm %s1731_s5, 256 }
 0x170   : > { %p1152_p12 = scmp.ne.s32.totalorder %s1592_s20, %s1151_s8  ;;  %p1156_p13 = scmp.lt.u32.totalorder %s1592_s20, %s1731_s5 }
 0x171   : > { %p1157_p6 = scmp.lt.u32.totalorder %s1155_s16, %s1151_s8  ;;  %p1159_p5 = scmp.lt.u32.totalorder %s1151_s8, %s1592_s20 }
 0x172   : > { %p1153_p1 = pnand %p1152_p12, %p1495_p10 }
 0x173   : > { %p1158_p3 = por %p1157_p6, %p1156_p13 }
 0x174   : > { %p1154_p11 = pneg %p1153_p1 }
 0x175   : > { %p1160_p7 = por %p1159_p5, %p1158_p3 }
 0x177   : > { %p1161_p9 = pnand %p1160_p7, %p1154_p11 }
 0x179   : > { %1164 = shalt.err (!%p1161_p9)
}
 0x17a   : > { %s1298_s24 = smov 64   ;;  %s1299_s14 = smov 4   ;;  %v869_v23 = vpack.c.bf16 %v536_v22, %v536_v22  ;;  %v905_v24 = vpop.f32.mrb[5].mxu0 }
 0x17b   : > { %922 = dma.vmem_to_hbm [thread:$0]  (%p1495_p10), %s1584_s7, 128, %s1592_s20, %s1608_s9, %s1298_s24, %s1298_s24, %s1299_s14  }
 0x17c   : > { %s575_s8 = scalar_lea.sflag [#allocation4], %s1556_s17  ;;  %s1165_s29 = scalar_lea.vmem %s1600_s13, 128 }
 0x17d   : > { %p1166_p0 = scmp.ne.s32.totalorder %s1600_s13, %s1165_s29  ;;  %s1300_s15 = smov [#allocation10]  }
 0x17e   : > { %s1169_s16 = sshll.u32 %s1300_s15, 4  ;;  %s1170_s16 = int_to_ptr.vmem [resolvable:$false] %s1169_s16 }
 0x17f   : > { %p1167_p2 = pnand %p1166_p0, %p1495_p10  ;;  %s1171_s27 = scalar_lea.vmem %s1170_s16, 256 }
 0x180   : > { %p1172_p8 = scmp.lt.s32.totalorder %s1600_s13, %s1170_s16  ;;  %p1173_p12 = scmp.lt.s32.totalorder %s1171_s27, %s1165_s29 }
 0x181   : > { %p1168_p4 = pneg %p1167_p2 }
 0x182   : > { %p1174_p1 = por %p1173_p12, %p1172_p8 }
 0x184   : > { %p1175_p11 = pnand %p1174_p1, %p1168_p4 }
 0x186   : > { %1178 = shalt.err (!%p1175_p11)
}
 0x187   : > { %s1179_s7 = scalar_lea.hbm %s1598_s18, 128  ;;  %s1183_s15 = scalar_lea.hbm %s1730_s4, 256 }
 0x188   : > { %p1180_p13 = scmp.ne.s32.totalorder %s1598_s18, %s1179_s7  ;;  %p1184_p5 = scmp.lt.u32.totalorder %s1598_s18, %s1730_s4 }
 0x189   : > { %p1185_p7 = scmp.lt.u32.totalorder %s1183_s15, %s1179_s7  ;;  %p1187_p0 = scmp.lt.u32.totalorder %s1179_s7, %s1598_s18 }
 0x18a   : > { %p1181_p6 = pnand %p1180_p13, %p1495_p10 }
 0x18b   : > { %p1186_p9 = por %p1185_p7, %p1184_p5 }
 0x18c   : > { %p1182_p3 = pneg %p1181_p6 }
 0x18d   : > { %p1188_p2 = por %p1187_p0, %p1186_p9 }
 0x18f   : > { %p1189_p4 = pnand %p1188_p2, %p1182_p3 }
 0x191   : > { %1192 = shalt.err (!%p1189_p4)
}
 0x192   : > { %921 = dma.vmem_to_hbm [thread:$0]  (%p1495_p10), %s1600_s13, 128, %s1598_s18, %s575_s8, %s1298_s24, %s1298_s24, %s1299_s14   ;;  %v539_v25 = vpop.f32.mrb[6].mxu0 }
 0x193   : > { %572 = vst.msk [vmem:[%s1605_s11] sm:$0xf] %vm551_vm2, %v869_v23  ;;  %s1755_s21 = sshll.u32 %s1605_s11, 4  ;;  %v870_v26 = vpack.c.bf16 %v539_v25, %v539_v25  ;;  %v906_v27 = vpop.f32.mrb[7].mxu0  ;;  %s1672_s27 = scalar_lea.hbm %s1732_s6, %s1582_s12  ;;  %s1666_s21 = int_to_ptr.vmem [resolvable:$true] %s1755_s21 }
 0x194   : > { %s1193_s7 = scalar_lea.vmem %s1666_s21, 128  ;;  %s1301_s13 = smov [#allocation13]  }
 0x195   : > { %573 = vst.msk [vmem:[%s1605_s11 + $0x4] sm:$0xf] %vm551_vm2, %v870_v26  ;;  %p1194_p8 = scmp.ne.s32.totalorder %s1666_s21, %s1193_s7  ;;  %s1197_s18 = sshll.u32 %s1301_s13, 4  ;;  %s1198_s18 = int_to_ptr.vmem [resolvable:$false] %s1197_s18 }
 0x196   : > { %s1199_s8 = scalar_lea.vmem %s1198_s18, 256  ;;  %p1200_p11 = scmp.lt.s32.totalorder %s1666_s21, %s1198_s18 }
 0x197   : > { %p1195_p12 = pnand %p1194_p8, %p1495_p10  ;;  %p1201_p13 = scmp.lt.s32.totalorder %s1199_s8, %s1193_s7 }
 0x199   : > { %p1196_p1 = pneg %p1195_p12  ;;  %p1202_p6 = por %p1201_p13, %p1200_p11 }
 0x19b   : > { %p1203_p3 = pnand %p1202_p6, %p1196_p1 }
 0x19d   : > { %1206 = shalt.err (!%p1203_p3)
}
 0x19e   : > { %s1207_s12 = scalar_lea.hbm %s1672_s27, 128  ;;  %s1211_s30 = scalar_lea.hbm %s1732_s6, 256 }
 0x19f   : > { %p1208_p5 = scmp.ne.s32.totalorder %s1672_s27, %s1207_s12  ;;  %p1212_p0 = scmp.lt.u32.totalorder %s1672_s27, %s1732_s6 }
 0x1a0   : > { %p1213_p2 = scmp.lt.u32.totalorder %s1211_s30, %s1207_s12  ;;  %p1215_p8 = scmp.lt.u32.totalorder %s1207_s12, %s1672_s27 }
 0x1a1   : > { %p1209_p7 = pnand %p1208_p5, %p1495_p10 }
 0x1a2   : > { %p1214_p4 = por %p1213_p2, %p1212_p0 }
 0x1a3   : > { %p1210_p9 = pneg %p1209_p7 }
 0x1a4   : > { %p1216_p12 = por %p1215_p8, %p1214_p4 }
 0x1a6   : > { %p1217_p1 = pnand %p1216_p12, %p1210_p9 }
 0x1a8   : > { %1220 = shalt.err (!%p1217_p1)
}
 0x1a9   : > { %923 = dma.vmem_to_hbm [thread:$0]  (%p1495_p10), %s1666_s21, 128, %s1672_s27, %s1608_s9, %s1298_s24, %s1298_s24, %s1299_s14  }
 0x1aa PF: > { %s1756_s17 = sld [smem:[#allocation19_spill]]  ;;  %s1757_s29 = sld [smem:[#allocation20_spill]] }
 0x1ab   : > { %p1759_p13 = scmp.ge.s32.totalorder %s1287_s26, 2 }
 0x1b0   : > { %s651_s7 = sand.u32 1, %s1756_s17   ;;  %p1758_p11 = scmp.ne.s32.totalorder %s1757_s29, 0 }
 0x1b1   : > { %s652_s13 = scalar_lea.sflag [#allocation4], %s651_s7 }
 0x1b2   : > { %p942_p6 = pnand %p1759_p13, %p1758_p11 }
 0x1b4   : > { %1258 = dma.done.wait (!%p942_p6), %s652_s13, 128  }
 0x1b5   : > { %1260 = vsyncadd (!%p942_p6), %s652_s13, 4294967168  ;;  %s1760_s28 = sadd.s32 4294967294, %s1287_s26  }
 0x1b6   : > { %s660_s18 = sand.u32 1, %s1760_s28  }
 0x1b7   : > { %s661_s8 = scalar_lea.sflag [#allocation12], %s660_s18 }
 0x1b8   : > { %1262 = dma.done.wait (!%p942_p6), %s661_s8, 256  }
 0x1b9   : > { %1264 = vsyncadd (!%p942_p6), %s661_s8, 4294967040  ;;  %s28_s26 = sadd.s32 1, %s1287_s26   ;;  %s1761_s21 = smov %s1271_s22 }
 0x1ba   : > { %p25_p10 = scmp.ge.s32.totalorder %s28_s26, 4   ;;  %s1762_s22 = smov %s1275_s23 }
 0x1bb   : > { %s1763_s23 = smov %s1507_s19  ;;  %s1764_s24 = smov %s1283_s25 }
 0x1bc   : > { %s1765_s25 = smov %s1767_s10  ;;  %27 = sbr.rel (!%p25_p10) target bundleno = 10 (0xa), region = 125 }
 0x1c3   :  { %675 = vsyncpa [#allocation3], 1 }
 0x1c4   :  { %677 = vsyncpa [#allocation3 + $0x1], 1 }
 0x1c5   :  { %678 = vsyncpa [#allocation6], 1 }
 0x1c6   :  { %679 = vsyncpa [#allocation9], 1 }
 0x1c7   :  { %680 = vsyncpa [#allocation4], 1 }
 0x1c8   :  { %682 = vsyncpa [#allocation4 + $0x1], 1 }
 0x1c9   :  { %683 = vsyncpa [#allocation12], 1 }
 0x1ca   :  { %685 = vsyncpa [#allocation12 + $0x1], 1 }

</bundles_post_ra>
